<compile_context>
chip_gen: v5e
topology: v5e:2x2
jax: 0.10.0
libtpu: 0.0.40
codegen_flags: <defaults>
</compile_context>

<pallas_src>
import jax
import jax.numpy as jnp
import numpy as np
from jax import lax
from jax.experimental import pallas as pl
from jax.experimental.pallas import tpu as pltpu


def lstm_kernel(x_ref, wih_ref, whh_ref, b_ref, alpha_ref, beta_ref,
                wout_ref, bout_ref, out_ref):
    """Full LSTM over time + per-step output projection, single program.

    x_ref     : (B, T)   batch-major input (input_dim == 1), VMEM
    wih_ref   : (1, 4H)  W_ih^T, i/f/o columns pre-scaled by 0.5, VMEM
    whh_ref   : (H, 4H)  W_hh^T, i/f/o columns pre-scaled by 0.5, VMEM
    b_ref     : (1, 4H)  b_ih + b_hh, i/f/o entries pre-scaled by 0.5, VMEM
    alpha_ref : (1, 4H)  0.5 on i/f/o lanes, 1.0 on g lanes, VMEM
    beta_ref  : (1, 4H)  0.5 on i/f/o lanes, 0.0 on g lanes, VMEM
    wout_ref  : (1, H)   Linear weight, VMEM
    bout_ref  : (1,)     Linear bias, SMEM (scalar)
    out_ref   : (B, T)   per-step predictions, VMEM

    PyTorch gate order along 4H: [i, f, g, o].
    sigmoid(z) == 0.5 * tanh(z / 2) + 0.5, so with the 0.5 pre-scale folded
    into the i/f/o weight/bias columns a single full-width tanh covers all
    four gates; the g lanes keep an identity affine.
    """
    B, T = x_ref.shape
    H = whh_ref.shape[0]

    # Loop-invariant loads / broadcasts, hoisted out of the recurrence
    # (JAX does not CSE broadcast_in_dim inside an unrolled loop).
    whh = whh_ref[...]                                       # (H, 4H)
    wih_b = jnp.broadcast_to(wih_ref[...], (B, 4 * H))       # (B, 4H)
    b_b = jnp.broadcast_to(b_ref[...], (B, 4 * H))
    alpha = jnp.broadcast_to(alpha_ref[...], (B, 4 * H))
    beta = jnp.broadcast_to(beta_ref[...], (B, 4 * H))
    wout_b = jnp.broadcast_to(wout_ref[...], (B, H))         # (B, H)
    b_out = bout_ref[0]                                      # scalar (SMEM)

    # x-side gate pre-activations for every step, computed up front so the
    # serial recurrence body only contains h-dependent work.
    x = x_ref[...]                                           # (B, T)
    xg = [x[:, t:t + 1] * wih_b + b_b for t in range(T)]     # T x (B, 4H)

    h = jnp.zeros((B, H), jnp.float32)
    c = jnp.zeros((B, H), jnp.float32)
    outs = []
    # T is small and static -> fully unrolled recurrence.
    for t in range(T):
        gates = xg[t] + jnp.dot(h, whh, preferred_element_type=jnp.float32)
        # One EUP tanh for all four gates, then a per-lane affine:
        # i/f/o lanes -> 0.5*tanh + 0.5 (= sigmoid of the unscaled preact),
        # g lanes     -> plain tanh.
        act = jnp.tanh(gates) * alpha + beta                 # (B, 4H)
        i_g = act[:, 0 * H:1 * H]
        f_g = act[:, 1 * H:2 * H]
        g_g = act[:, 2 * H:3 * H]
        o_g = act[:, 3 * H:4 * H]
        c = f_g * c + i_g * g_g
        h = o_g * jnp.tanh(c)
        # Output projection (out_features == 1): VPU mul + lane reduce over H.
        # Off the serial h->h critical path; result kept in registers.
        outs.append(jnp.sum(h * wout_b, axis=-1, keepdims=True))   # (B, 1)

    # Single store of all T predictions; output bias added once.
    out_ref[...] = jnp.concatenate(outs, axis=-1) + b_out


def make_lstm_params(key, hidden_dim):
    """Deterministic init matching PyTorch default U(-1/sqrt(H), 1/sqrt(H))."""
    k = 1.0 / np.sqrt(hidden_dim)
    ks = jax.random.split(key, 6)
    u = lambda kk, shape: jax.random.uniform(kk, shape, jnp.float32, -k, k)
    params = {
        "w_ih": u(ks[0], (4 * hidden_dim, 1)),           # PyTorch weight_ih_l0
        "w_hh": u(ks[1], (4 * hidden_dim, hidden_dim)),  # PyTorch weight_hh_l0
        "b_ih": u(ks[2], (4 * hidden_dim,)),
        "b_hh": u(ks[3], (4 * hidden_dim,)),
        "w_out": u(ks[4], (1, hidden_dim)),              # Linear.weight
        "b_out": u(ks[5], (1,)),                         # Linear.bias
    }
    return params


def lstm_forward(seq, params, win_len, hidden_dim):
    """Equivalent of LSTM.forward: seq.view(-1, win_len, 1) -> lstm -> linear."""
    H = hidden_dim
    x = seq.reshape(-1, win_len).astype(jnp.float32)     # (B, T), input_dim==1
    B, T = x.shape

    # Fold the 0.5 sigmoid pre-scale into the i/f/o gate columns so the kernel
    # needs a single tanh for all four gates.  PyTorch gate order: [i, f, g, o].
    gate_scale = np.full((1, 4 * H), 0.5, np.float32)
    gate_scale[:, 2 * H:3 * H] = 1.0                      # g gate: plain tanh
    alpha = jnp.asarray(gate_scale)                       # 0.5 on i/f/o, 1.0 on g
    beta_np = np.full((1, 4 * H), 0.5, np.float32)
    beta_np[:, 2 * H:3 * H] = 0.0
    beta = jnp.asarray(beta_np)                           # 0.5 on i/f/o, 0.0 on g

    w_ih = params["w_ih"].reshape(1, 4 * H) * gate_scale  # (1, 4H) = W_ih^T (scaled)
    w_hh = params["w_hh"].T * gate_scale                  # (H, 4H) = W_hh^T (scaled)
    b = (params["b_ih"] + params["b_hh"]).reshape(1, 4 * H) * gate_scale
    w_out = params["w_out"].reshape(1, H)                 # (1, H)
    b_out = params["b_out"].reshape(1)                    # (1,) scalar for SMEM

    vmem = pl.BlockSpec(memory_space=pltpu.MemorySpace.VMEM)
    smem = pl.BlockSpec(memory_space=pltpu.MemorySpace.SMEM)
    out = pl.pallas_call(
        lstm_kernel,
        out_shape=jax.ShapeDtypeStruct((B, T), jnp.float32),
        in_specs=[vmem, vmem, vmem, vmem, vmem, vmem, vmem, smem],
        out_specs=vmem,
    )(x, w_ih, w_hh, b, alpha, beta, w_out, b_out)

    return out[:, :, None]                                # (B, T, 1), free reshape


def lstm_reference(seq, params, win_len, hidden_dim):
    """Pure-JAX reference matching torch.nn.LSTM + Linear semantics."""
    H = hidden_dim
    x = seq.reshape(-1, win_len, 1).astype(jnp.float32)
    B = x.shape[0]
    w_ih, w_hh = params["w_ih"], params["w_hh"]
    b = params["b_ih"] + params["b_hh"]

    def step(carry, x_t):
        h, c = carry
        gates = x_t @ w_ih.T + h @ w_hh.T + b
        i = jax.nn.sigmoid(gates[:, 0 * H:1 * H])
        f = jax.nn.sigmoid(gates[:, 1 * H:2 * H])
        g = jnp.tanh(gates[:, 2 * H:3 * H])
        o = jax.nn.sigmoid(gates[:, 3 * H:4 * H])
        c = f * c + i * g
        h = o * jnp.tanh(c)
        return (h, c), h

    h0 = jnp.zeros((B, H), jnp.float32)
    c0 = jnp.zeros((B, H), jnp.float32)
    _, hs = lax.scan(step, (h0, c0), jnp.transpose(x, (1, 0, 2)))  # (T, B, H)
    hs = jnp.transpose(hs, (1, 0, 2))                              # (B, T, H)
    return hs @ params["w_out"].T + params["b_out"]                # (B, T, 1)


if __name__ == "__main__":
    WIN_LEN = 8
    HIDDEN = 32
    BATCH = 2

    key = jax.random.PRNGKey(0)
    k_x, k_p = jax.random.split(key)
    seq = jax.random.normal(k_x, (BATCH, WIN_LEN, 1), jnp.float32)
    params = make_lstm_params(k_p, HIDDEN)

    out = lstm_forward(seq, params, WIN_LEN, HIDDEN)
    out = jax.block_until_ready(out)

    ref = jax.block_until_ready(lstm_reference(seq, params, WIN_LEN, HIDDEN))
    assert out.shape == (BATCH, WIN_LEN, 1)
    np.testing.assert_allclose(np.asarray(out), np.asarray(ref),
                               rtol=1e-2, atol=1e-2)
    print("KERNEL_OK")
</pallas_src>

<mosaic_0001>
module attributes {stable_mosaic.version = 11 : i64} {
  func.func @lstm_kernel(%arg0: memref<2x8xf32, #tpu.memory_space<vmem>>, %arg1: memref<1x128xf32, #tpu.memory_space<vmem>>, %arg2: memref<32x128xf32, #tpu.memory_space<vmem>>, %arg3: memref<1x128xf32, #tpu.memory_space<vmem>>, %arg4: memref<1x128xf32, #tpu.memory_space<vmem>>, %arg5: memref<1x128xf32, #tpu.memory_space<vmem>>, %arg6: memref<1x32xf32, #tpu.memory_space<vmem>>, %arg7: memref<1xf32, #tpu.memory_space<smem>>, %arg8: memref<2x8xf32, #tpu.memory_space<vmem>>) attributes {dimension_semantics = [], scalar_prefetch = 0 : i64, scratch_operands = 0 : i64, tpu.core_type = #tpu.core_type<tc>} {
    %c0 = arith.constant 0 : index
    %c0_0 = arith.constant 0 : index
    %0 = vector.load %arg2[%c0, %c0_0] : memref<32x128xf32, #tpu.memory_space<vmem>>, vector<32x128xf32>
    %c0_1 = arith.constant 0 : index
    %c0_2 = arith.constant 0 : index
    %1 = vector.load %arg1[%c0_1, %c0_2] : memref<1x128xf32, #tpu.memory_space<vmem>>, vector<1x128xf32>
    %2 = vector.shape_cast %1 : vector<1x128xf32> to vector<1x128xf32>
    %3 = vector.broadcast %2 : vector<1x128xf32> to vector<2x128xf32>
    %c0_3 = arith.constant 0 : index
    %c0_4 = arith.constant 0 : index
    %4 = vector.load %arg3[%c0_3, %c0_4] : memref<1x128xf32, #tpu.memory_space<vmem>>, vector<1x128xf32>
    %5 = vector.shape_cast %4 : vector<1x128xf32> to vector<1x128xf32>
    %6 = vector.broadcast %5 : vector<1x128xf32> to vector<2x128xf32>
    %c0_5 = arith.constant 0 : index
    %c0_6 = arith.constant 0 : index
    %7 = vector.load %arg4[%c0_5, %c0_6] : memref<1x128xf32, #tpu.memory_space<vmem>>, vector<1x128xf32>
    %8 = vector.shape_cast %7 : vector<1x128xf32> to vector<1x128xf32>
    %9 = vector.broadcast %8 : vector<1x128xf32> to vector<2x128xf32>
    %c0_7 = arith.constant 0 : index
    %c0_8 = arith.constant 0 : index
    %10 = vector.load %arg5[%c0_7, %c0_8] : memref<1x128xf32, #tpu.memory_space<vmem>>, vector<1x128xf32>
    %11 = vector.shape_cast %10 : vector<1x128xf32> to vector<1x128xf32>
    %12 = vector.broadcast %11 : vector<1x128xf32> to vector<2x128xf32>
    %c0_9 = arith.constant 0 : index
    %c0_10 = arith.constant 0 : index
    %13 = vector.load %arg6[%c0_9, %c0_10] : memref<1x32xf32, #tpu.memory_space<vmem>>, vector<1x32xf32>
    %14 = vector.shape_cast %13 : vector<1x32xf32> to vector<1x32xf32>
    %15 = vector.broadcast %14 : vector<1x32xf32> to vector<2x32xf32>
    %c0_11 = arith.constant 0 : index
    %16 = memref.load %arg7[%c0_11] : memref<1xf32, #tpu.memory_space<smem>>
    %c0_12 = arith.constant 0 : index
    %c0_13 = arith.constant 0 : index
    %17 = vector.load %arg0[%c0_12, %c0_13] : memref<2x8xf32, #tpu.memory_space<vmem>>, vector<2x8xf32>
    %18 = vector.extract_strided_slice %17 {offsets = [0, 0], sizes = [2, 1], strides = [1, 1]} : vector<2x8xf32> to vector<2x1xf32>
    %19 = vector.broadcast %18 : vector<2x1xf32> to vector<2x128xf32>
    %20 = arith.mulf %19, %3 : vector<2x128xf32>
    %21 = arith.addf %20, %6 : vector<2x128xf32>
    %22 = vector.extract_strided_slice %17 {offsets = [0, 1], sizes = [2, 1], strides = [1, 1]} : vector<2x8xf32> to vector<2x1xf32>
    %23 = vector.broadcast %22 : vector<2x1xf32> to vector<2x128xf32>
    %24 = arith.mulf %23, %3 : vector<2x128xf32>
    %25 = arith.addf %24, %6 : vector<2x128xf32>
    %26 = vector.extract_strided_slice %17 {offsets = [0, 2], sizes = [2, 1], strides = [1, 1]} : vector<2x8xf32> to vector<2x1xf32>
    %27 = vector.broadcast %26 : vector<2x1xf32> to vector<2x128xf32>
    %28 = arith.mulf %27, %3 : vector<2x128xf32>
    %29 = arith.addf %28, %6 : vector<2x128xf32>
    %30 = vector.extract_strided_slice %17 {offsets = [0, 3], sizes = [2, 1], strides = [1, 1]} : vector<2x8xf32> to vector<2x1xf32>
    %31 = vector.broadcast %30 : vector<2x1xf32> to vector<2x128xf32>
    %32 = arith.mulf %31, %3 : vector<2x128xf32>
    %33 = arith.addf %32, %6 : vector<2x128xf32>
    %34 = vector.extract_strided_slice %17 {offsets = [0, 4], sizes = [2, 1], strides = [1, 1]} : vector<2x8xf32> to vector<2x1xf32>
    %35 = vector.broadcast %34 : vector<2x1xf32> to vector<2x128xf32>
    %36 = arith.mulf %35, %3 : vector<2x128xf32>
    %37 = arith.addf %36, %6 : vector<2x128xf32>
    %38 = vector.extract_strided_slice %17 {offsets = [0, 5], sizes = [2, 1], strides = [1, 1]} : vector<2x8xf32> to vector<2x1xf32>
    %39 = vector.broadcast %38 : vector<2x1xf32> to vector<2x128xf32>
    %40 = arith.mulf %39, %3 : vector<2x128xf32>
    %41 = arith.addf %40, %6 : vector<2x128xf32>
    %42 = vector.extract_strided_slice %17 {offsets = [0, 6], sizes = [2, 1], strides = [1, 1]} : vector<2x8xf32> to vector<2x1xf32>
    %43 = vector.broadcast %42 : vector<2x1xf32> to vector<2x128xf32>
    %44 = arith.mulf %43, %3 : vector<2x128xf32>
    %45 = arith.addf %44, %6 : vector<2x128xf32>
    %46 = vector.extract_strided_slice %17 {offsets = [0, 7], sizes = [2, 1], strides = [1, 1]} : vector<2x8xf32> to vector<2x1xf32>
    %47 = vector.broadcast %46 : vector<2x1xf32> to vector<2x128xf32>
    %48 = arith.mulf %47, %3 : vector<2x128xf32>
    %49 = arith.addf %48, %6 : vector<2x128xf32>
    %cst = arith.constant 0.000000e+00 : f32
    %50 = vector.broadcast %cst : f32 to vector<2x32xf32>
    %cst_14 = arith.constant 0.000000e+00 : f32
    %51 = vector.broadcast %cst_14 : f32 to vector<2x32xf32>
    %cst_15 = arith.constant dense<0.000000e+00> : vector<2x128xf32>
    %52 = tpu.matmul %50, %0, %cst_15 {dimension_numbers = #tpu.dot_dimension_numbers<[1], [0], [0], [1], [0, 0, 1, 1], [], []>} : vector<2x32xf32>, vector<32x128xf32>, vector<2x128xf32> -> vector<2x128xf32>
    %53 = arith.addf %21, %52 : vector<2x128xf32>
    %54 = math.tanh %53 : vector<2x128xf32>
    %55 = arith.mulf %54, %9 : vector<2x128xf32>
    %56 = arith.addf %55, %12 : vector<2x128xf32>
    %57 = vector.extract_strided_slice %56 {offsets = [0, 0], sizes = [2, 32], strides = [1, 1]} : vector<2x128xf32> to vector<2x32xf32>
    %58 = vector.extract_strided_slice %56 {offsets = [0, 32], sizes = [2, 32], strides = [1, 1]} : vector<2x128xf32> to vector<2x32xf32>
    %59 = vector.extract_strided_slice %56 {offsets = [0, 64], sizes = [2, 32], strides = [1, 1]} : vector<2x128xf32> to vector<2x32xf32>
    %60 = vector.extract_strided_slice %56 {offsets = [0, 96], sizes = [2, 32], strides = [1, 1]} : vector<2x128xf32> to vector<2x32xf32>
    %61 = arith.mulf %58, %51 : vector<2x32xf32>
    %62 = arith.mulf %57, %59 : vector<2x32xf32>
    %63 = arith.addf %61, %62 : vector<2x32xf32>
    %64 = math.tanh %63 : vector<2x32xf32>
    %65 = arith.mulf %60, %64 : vector<2x32xf32>
    %66 = arith.mulf %65, %15 : vector<2x32xf32>
    %cst_16 = arith.constant dense<0.000000e+00> : vector<2xf32>
    %67 = vector.multi_reduction <add>, %66, %cst_16 [1] : vector<2x32xf32> to vector<2xf32>
    %68 = vector.shape_cast %67 : vector<2xf32> to vector<2x1xf32>
    %cst_17 = arith.constant dense<0.000000e+00> : vector<2x128xf32>
    %69 = tpu.matmul %65, %0, %cst_17 {dimension_numbers = #tpu.dot_dimension_numbers<[1], [0], [0], [1], [0, 0, 1, 1], [], []>} : vector<2x32xf32>, vector<32x128xf32>, vector<2x128xf32> -> vector<2x128xf32>
    %70 = arith.addf %25, %69 : vector<2x128xf32>
    %71 = math.tanh %70 : vector<2x128xf32>
    %72 = arith.mulf %71, %9 : vector<2x128xf32>
    %73 = arith.addf %72, %12 : vector<2x128xf32>
    %74 = vector.extract_strided_slice %73 {offsets = [0, 0], sizes = [2, 32], strides = [1, 1]} : vector<2x128xf32> to vector<2x32xf32>
    %75 = vector.extract_strided_slice %73 {offsets = [0, 32], sizes = [2, 32], strides = [1, 1]} : vector<2x128xf32> to vector<2x32xf32>
    %76 = vector.extract_strided_slice %73 {offsets = [0, 64], sizes = [2, 32], strides = [1, 1]} : vector<2x128xf32> to vector<2x32xf32>
    %77 = vector.extract_strided_slice %73 {offsets = [0, 96], sizes = [2, 32], strides = [1, 1]} : vector<2x128xf32> to vector<2x32xf32>
    %78 = arith.mulf %75, %63 : vector<2x32xf32>
    %79 = arith.mulf %74, %76 : vector<2x32xf32>
    %80 = arith.addf %78, %79 : vector<2x32xf32>
    %81 = math.tanh %80 : vector<2x32xf32>
    %82 = arith.mulf %77, %81 : vector<2x32xf32>
    %83 = arith.mulf %82, %15 : vector<2x32xf32>
    %cst_18 = arith.constant dense<0.000000e+00> : vector<2xf32>
    %84 = vector.multi_reduction <add>, %83, %cst_18 [1] : vector<2x32xf32> to vector<2xf32>
    %85 = vector.shape_cast %84 : vector<2xf32> to vector<2x1xf32>
    %cst_19 = arith.constant dense<0.000000e+00> : vector<2x128xf32>
    %86 = tpu.matmul %82, %0, %cst_19 {dimension_numbers = #tpu.dot_dimension_numbers<[1], [0], [0], [1], [0, 0, 1, 1], [], []>} : vector<2x32xf32>, vector<32x128xf32>, vector<2x128xf32> -> vector<2x128xf32>
    %87 = arith.addf %29, %86 : vector<2x128xf32>
    %88 = math.tanh %87 : vector<2x128xf32>
    %89 = arith.mulf %88, %9 : vector<2x128xf32>
    %90 = arith.addf %89, %12 : vector<2x128xf32>
    %91 = vector.extract_strided_slice %90 {offsets = [0, 0], sizes = [2, 32], strides = [1, 1]} : vector<2x128xf32> to vector<2x32xf32>
    %92 = vector.extract_strided_slice %90 {offsets = [0, 32], sizes = [2, 32], strides = [1, 1]} : vector<2x128xf32> to vector<2x32xf32>
    %93 = vector.extract_strided_slice %90 {offsets = [0, 64], sizes = [2, 32], strides = [1, 1]} : vector<2x128xf32> to vector<2x32xf32>
    %94 = vector.extract_strided_slice %90 {offsets = [0, 96], sizes = [2, 32], strides = [1, 1]} : vector<2x128xf32> to vector<2x32xf32>
    %95 = arith.mulf %92, %80 : vector<2x32xf32>
    %96 = arith.mulf %91, %93 : vector<2x32xf32>
    %97 = arith.addf %95, %96 : vector<2x32xf32>
    %98 = math.tanh %97 : vector<2x32xf32>
    %99 = arith.mulf %94, %98 : vector<2x32xf32>
    %100 = arith.mulf %99, %15 : vector<2x32xf32>
    %cst_20 = arith.constant dense<0.000000e+00> : vector<2xf32>
    %101 = vector.multi_reduction <add>, %100, %cst_20 [1] : vector<2x32xf32> to vector<2xf32>
    %102 = vector.shape_cast %101 : vector<2xf32> to vector<2x1xf32>
    %cst_21 = arith.constant dense<0.000000e+00> : vector<2x128xf32>
    %103 = tpu.matmul %99, %0, %cst_21 {dimension_numbers = #tpu.dot_dimension_numbers<[1], [0], [0], [1], [0, 0, 1, 1], [], []>} : vector<2x32xf32>, vector<32x128xf32>, vector<2x128xf32> -> vector<2x128xf32>
    %104 = arith.addf %33, %103 : vector<2x128xf32>
    %105 = math.tanh %104 : vector<2x128xf32>
    %106 = arith.mulf %105, %9 : vector<2x128xf32>
    %107 = arith.addf %106, %12 : vector<2x128xf32>
    %108 = vector.extract_strided_slice %107 {offsets = [0, 0], sizes = [2, 32], strides = [1, 1]} : vector<2x128xf32> to vector<2x32xf32>
    %109 = vector.extract_strided_slice %107 {offsets = [0, 32], sizes = [2, 32], strides = [1, 1]} : vector<2x128xf32> to vector<2x32xf32>
    %110 = vector.extract_strided_slice %107 {offsets = [0, 64], sizes = [2, 32], strides = [1, 1]} : vector<2x128xf32> to vector<2x32xf32>
    %111 = vector.extract_strided_slice %107 {offsets = [0, 96], sizes = [2, 32], strides = [1, 1]} : vector<2x128xf32> to vector<2x32xf32>
    %112 = arith.mulf %109, %97 : vector<2x32xf32>
    %113 = arith.mulf %108, %110 : vector<2x32xf32>
    %114 = arith.addf %112, %113 : vector<2x32xf32>
    %115 = math.tanh %114 : vector<2x32xf32>
    %116 = arith.mulf %111, %115 : vector<2x32xf32>
    %117 = arith.mulf %116, %15 : vector<2x32xf32>
    %cst_22 = arith.constant dense<0.000000e+00> : vector<2xf32>
    %118 = vector.multi_reduction <add>, %117, %cst_22 [1] : vector<2x32xf32> to vector<2xf32>
    %119 = vector.shape_cast %118 : vector<2xf32> to vector<2x1xf32>
    %cst_23 = arith.constant dense<0.000000e+00> : vector<2x128xf32>
    %120 = tpu.matmul %116, %0, %cst_23 {dimension_numbers = #tpu.dot_dimension_numbers<[1], [0], [0], [1], [0, 0, 1, 1], [], []>} : vector<2x32xf32>, vector<32x128xf32>, vector<2x128xf32> -> vector<2x128xf32>
    %121 = arith.addf %37, %120 : vector<2x128xf32>
    %122 = math.tanh %121 : vector<2x128xf32>
    %123 = arith.mulf %122, %9 : vector<2x128xf32>
    %124 = arith.addf %123, %12 : vector<2x128xf32>
    %125 = vector.extract_strided_slice %124 {offsets = [0, 0], sizes = [2, 32], strides = [1, 1]} : vector<2x128xf32> to vector<2x32xf32>
    %126 = vector.extract_strided_slice %124 {offsets = [0, 32], sizes = [2, 32], strides = [1, 1]} : vector<2x128xf32> to vector<2x32xf32>
    %127 = vector.extract_strided_slice %124 {offsets = [0, 64], sizes = [2, 32], strides = [1, 1]} : vector<2x128xf32> to vector<2x32xf32>
    %128 = vector.extract_strided_slice %124 {offsets = [0, 96], sizes = [2, 32], strides = [1, 1]} : vector<2x128xf32> to vector<2x32xf32>
    %129 = arith.mulf %126, %114 : vector<2x32xf32>
    %130 = arith.mulf %125, %127 : vector<2x32xf32>
    %131 = arith.addf %129, %130 : vector<2x32xf32>
    %132 = math.tanh %131 : vector<2x32xf32>
    %133 = arith.mulf %128, %132 : vector<2x32xf32>
    %134 = arith.mulf %133, %15 : vector<2x32xf32>
    %cst_24 = arith.constant dense<0.000000e+00> : vector<2xf32>
    %135 = vector.multi_reduction <add>, %134, %cst_24 [1] : vector<2x32xf32> to vector<2xf32>
    %136 = vector.shape_cast %135 : vector<2xf32> to vector<2x1xf32>
    %cst_25 = arith.constant dense<0.000000e+00> : vector<2x128xf32>
    %137 = tpu.matmul %133, %0, %cst_25 {dimension_numbers = #tpu.dot_dimension_numbers<[1], [0], [0], [1], [0, 0, 1, 1], [], []>} : vector<2x32xf32>, vector<32x128xf32>, vector<2x128xf32> -> vector<2x128xf32>
    %138 = arith.addf %41, %137 : vector<2x128xf32>
    %139 = math.tanh %138 : vector<2x128xf32>
    %140 = arith.mulf %139, %9 : vector<2x128xf32>
    %141 = arith.addf %140, %12 : vector<2x128xf32>
    %142 = vector.extract_strided_slice %141 {offsets = [0, 0], sizes = [2, 32], strides = [1, 1]} : vector<2x128xf32> to vector<2x32xf32>
    %143 = vector.extract_strided_slice %141 {offsets = [0, 32], sizes = [2, 32], strides = [1, 1]} : vector<2x128xf32> to vector<2x32xf32>
    %144 = vector.extract_strided_slice %141 {offsets = [0, 64], sizes = [2, 32], strides = [1, 1]} : vector<2x128xf32> to vector<2x32xf32>
    %145 = vector.extract_strided_slice %141 {offsets = [0, 96], sizes = [2, 32], strides = [1, 1]} : vector<2x128xf32> to vector<2x32xf32>
    %146 = arith.mulf %143, %131 : vector<2x32xf32>
    %147 = arith.mulf %142, %144 : vector<2x32xf32>
    %148 = arith.addf %146, %147 : vector<2x32xf32>
    %149 = math.tanh %148 : vector<2x32xf32>
    %150 = arith.mulf %145, %149 : vector<2x32xf32>
    %151 = arith.mulf %150, %15 : vector<2x32xf32>
    %cst_26 = arith.constant dense<0.000000e+00> : vector<2xf32>
    %152 = vector.multi_reduction <add>, %151, %cst_26 [1] : vector<2x32xf32> to vector<2xf32>
    %153 = vector.shape_cast %152 : vector<2xf32> to vector<2x1xf32>
    %cst_27 = arith.constant dense<0.000000e+00> : vector<2x128xf32>
    %154 = tpu.matmul %150, %0, %cst_27 {dimension_numbers = #tpu.dot_dimension_numbers<[1], [0], [0], [1], [0, 0, 1, 1], [], []>} : vector<2x32xf32>, vector<32x128xf32>, vector<2x128xf32> -> vector<2x128xf32>
    %155 = arith.addf %45, %154 : vector<2x128xf32>
    %156 = math.tanh %155 : vector<2x128xf32>
    %157 = arith.mulf %156, %9 : vector<2x128xf32>
    %158 = arith.addf %157, %12 : vector<2x128xf32>
    %159 = vector.extract_strided_slice %158 {offsets = [0, 0], sizes = [2, 32], strides = [1, 1]} : vector<2x128xf32> to vector<2x32xf32>
    %160 = vector.extract_strided_slice %158 {offsets = [0, 32], sizes = [2, 32], strides = [1, 1]} : vector<2x128xf32> to vector<2x32xf32>
    %161 = vector.extract_strided_slice %158 {offsets = [0, 64], sizes = [2, 32], strides = [1, 1]} : vector<2x128xf32> to vector<2x32xf32>
    %162 = vector.extract_strided_slice %158 {offsets = [0, 96], sizes = [2, 32], strides = [1, 1]} : vector<2x128xf32> to vector<2x32xf32>
    %163 = arith.mulf %160, %148 : vector<2x32xf32>
    %164 = arith.mulf %159, %161 : vector<2x32xf32>
    %165 = arith.addf %163, %164 : vector<2x32xf32>
    %166 = math.tanh %165 : vector<2x32xf32>
    %167 = arith.mulf %162, %166 : vector<2x32xf32>
    %168 = arith.mulf %167, %15 : vector<2x32xf32>
    %cst_28 = arith.constant dense<0.000000e+00> : vector<2xf32>
    %169 = vector.multi_reduction <add>, %168, %cst_28 [1] : vector<2x32xf32> to vector<2xf32>
    %170 = vector.shape_cast %169 : vector<2xf32> to vector<2x1xf32>
    %cst_29 = arith.constant dense<0.000000e+00> : vector<2x128xf32>
    %171 = tpu.matmul %167, %0, %cst_29 {dimension_numbers = #tpu.dot_dimension_numbers<[1], [0], [0], [1], [0, 0, 1, 1], [], []>} : vector<2x32xf32>, vector<32x128xf32>, vector<2x128xf32> -> vector<2x128xf32>
    %172 = arith.addf %49, %171 : vector<2x128xf32>
    %173 = math.tanh %172 : vector<2x128xf32>
    %174 = arith.mulf %173, %9 : vector<2x128xf32>
    %175 = arith.addf %174, %12 : vector<2x128xf32>
    %176 = vector.extract_strided_slice %175 {offsets = [0, 0], sizes = [2, 32], strides = [1, 1]} : vector<2x128xf32> to vector<2x32xf32>
    %177 = vector.extract_strided_slice %175 {offsets = [0, 32], sizes = [2, 32], strides = [1, 1]} : vector<2x128xf32> to vector<2x32xf32>
    %178 = vector.extract_strided_slice %175 {offsets = [0, 64], sizes = [2, 32], strides = [1, 1]} : vector<2x128xf32> to vector<2x32xf32>
    %179 = vector.extract_strided_slice %175 {offsets = [0, 96], sizes = [2, 32], strides = [1, 1]} : vector<2x128xf32> to vector<2x32xf32>
    %180 = arith.mulf %177, %165 : vector<2x32xf32>
    %181 = arith.mulf %176, %178 : vector<2x32xf32>
    %182 = arith.addf %180, %181 : vector<2x32xf32>
    %183 = math.tanh %182 : vector<2x32xf32>
    %184 = arith.mulf %179, %183 : vector<2x32xf32>
    %185 = arith.mulf %184, %15 : vector<2x32xf32>
    %cst_30 = arith.constant dense<0.000000e+00> : vector<2xf32>
    %186 = vector.multi_reduction <add>, %185, %cst_30 [1] : vector<2x32xf32> to vector<2xf32>
    %187 = vector.shape_cast %186 : vector<2xf32> to vector<2x1xf32>
    %188 = tpu.concatenate %68, %85, %102, %119, %136, %153, %170, %187 in 1 : vector<2x1xf32>, vector<2x1xf32>, vector<2x1xf32>, vector<2x1xf32>, vector<2x1xf32>, vector<2x1xf32>, vector<2x1xf32>, vector<2x1xf32> -> vector<2x8xf32>
    %189 = vector.broadcast %16 : f32 to vector<2x8xf32>
    %190 = arith.addf %188, %189 : vector<2x8xf32>
    %c0_31 = arith.constant 0 : index
    %c0_32 = arith.constant 0 : index
    %191 = vector.load %arg8[%c0_31, %c0_32] : memref<2x8xf32, #tpu.memory_space<vmem>>, vector<2x8xf32>
    tpu.vector_store %arg8[%c0_31, %c0_32], %190 {strides = array<i32>} : memref<2x8xf32, #tpu.memory_space<vmem>>, vector<2x8xf32>,
    return
  }
}

</mosaic_0001>

<bundles_post_ra>
// kernel: tpu_custom_call.1
= control target key start
LH: loop header
LB: loop body
LE: loop exit
PB: predicated region body
PF: predicated region fallthrough
CT: control target
= control target key end

     0   :  { %14 = vsyncpa [#allocation4], 0  ;;  %s970_s0 = inlined_call_operand.vmem [shape: f32[2,8], index: 0, kind: input, shape index: {}]   ;;  %s971_s1 = inlined_call_operand.hbm [shape: f32[1,128], index: 1, kind: input, shape index: {}]   ;;  %s972_s2 = inlined_call_operand.hbm [shape: f32[32,128], index: 2, kind: input, shape index: {}]   ;;  %s973_s3 = inlined_call_operand.vmem [shape: f32[1,128], index: 3, kind: input, shape index: {}]   ;;  %s974_s4 = inlined_call_operand.vmem [shape: f32[1,128], index: 4, kind: input, shape index: {}]   ;;  %s975_s5 = inlined_call_operand.vmem [shape: f32[1,128], index: 5, kind: input, shape index: {}]   ;;  %s976_s6 = inlined_call_operand.vmem [shape: f32[1,32], index: 6, kind: input, shape index: {}]   ;;  %s977_s7 = inlined_call_operand.<no memory space> [shape: f32[1], index: 7, kind: input, shape index: {}]   ;;  %s978_s8 = inlined_call_operand.hbm [shape: f32[2,8], index: 8, kind: output, shape index: {}]  }
   0x1   :  { %15 = vsyncpa [#allocation7], 0 }
   0x2   :  { %16 = vsyncpa [#allocation5], 0  ;;  %s24_s29 = sshll.u32 %s971_s1, 4  ;;  %s753_s30 = smov [#allocation3]   ;;  %s25_s29 = int_to_ptr.hbm [resolvable:$true] %s24_s29 }
   0x3   :  { %s26_s9 = sshll.u32 %s753_s30, 4  ;;  %s34_s12 = sshll.u32 %s972_s2, 4  ;;  %s27_s9 = int_to_ptr.vmem [resolvable:$true] %s26_s9  ;;  %s35_s12 = int_to_ptr.hbm [resolvable:$true] %s34_s12 }
   0x4   :  { %29 = dma.hbm_to_vmem [thread:$0]  %s25_s29, 16, %s27_s9, [#allocation4]  }
   0x5   :  { %s754_s13 = smov [#allocation6]   ;;  %s755_s15 = smov 128  }
   0x6   :  { %s36_s14 = sshll.u32 %s754_s13, 4  ;;  %s756_s16 = smov 8   ;;  %s37_s14 = int_to_ptr.vmem [resolvable:$true] %s36_s14 }
   0x7   :  { %42 = dma.hbm_to_vmem [thread:$0]  %s35_s12, 512, %s37_s14, [#allocation7], %s755_s15, %s755_s15, %s756_s16  }
   0x8   :  { %747 = dma.done.wait [#allocation4], 16  }
   0x9   :  { %748 = vsyncadd [#allocation4], 4294967280 }
   0xa   :  { %749 = dma.done.wait [#allocation7], 512  }
   0xb   :  { %750 = vsyncadd [#allocation7], 4294966784  ;;  %v757_v0 = vmov 0   ;;  %v64_v1 = vld [vmem:[#allocation6 + $0x18] sm:$0xff]  ;;  %v63_v2 = vld [vmem:[#allocation6 + $0x10] sm:$0xff]  ;;  %v758_v6 = vmov 0.0  }
   0xc   :  { %630 = vset.pattern.permute.xlu0 %v757_v0  ;;  %151 = vmatpush.msra.mxu0 %v64_v1  ;;  %v62_v3 = vld [vmem:[#allocation6 + $0x8] sm:$0xff]  ;;  %v824_v4 = vld [vmem:[%s970_s0] sm:$0x3]  ;;  %v61_v5 = vld [vmem:[#allocation6] sm:$0xff]  ;;  %s760_s22 = smov 32   ;;  %v761_v27 = vmov 1  }
   0xd   :  { %209 = vmatpush.msra.mxu1 %v64_v1  ;;  %88 = vperm.xlu0 %630, %v824_v4   ;;  %v827_v7 = vld [vmem:[#allocation3] ss:$0 sm:$0xff]  ;;  %vm135_vm0 = vcmask 261120   ;;  %v762_v45 = vmov 2   ;;  %v763_v63 = vmov 3   ;;  %s768_s23 = smov 96  }
   0xe   :  { %263 = vmatpush.msra.mxu2 %v64_v1  ;;  %152 = vmatpush.msra.mxu0 %v63_v2  ;;  %v833_v10 = vld [vmem:[%s973_s3] ss:$0 sm:$0xff]  ;;  %s759_s3 = smov 64   ;;  %vm188_vm1 = vcmask 254976   ;;  %vm570_vm2 = vcmask 7168   ;;  %vm572_vm3 = vcmask 15360  }
   0xf   :  { %210 = vmatpush.msra.mxu1 %v63_v2  ;;  %317 = vmatpush.msra.mxu3 %v64_v1  ;;  %v839_v14 = vld [vmem:[%s974_s4] ss:$0 sm:$0xff]  ;;  %vm574_vm4 = vcmask 23552   ;;  %vm576_vm5 = vcmask 31744   ;;  %vm578_vm6 = vcmask 39936   ;;  %vm580_vm7 = vcmask 48128  }
  0x10   :  { %264 = vmatpush.msra.mxu2 %v63_v2  ;;  %153 = vmatpush.msra.mxu0 %v62_v3  ;;  %v844_v15 = vld [vmem:[%s975_s5] ss:$0 sm:$0xff]  ;;  %vm582_vm8 = vcmask 56320   ;;  %s769_s25 = smov [#allocation8]   ;;  %s595_s29 = sshll.u32 %s978_s8, 4  ;;  %vm586_vm9 = vcmask 58368   ;;  %s596_s29 = int_to_ptr.hbm [resolvable:$true] %s595_s29 }
  0x11   :  { %211 = vmatpush.msra.mxu1 %v62_v3  ;;  %318 = vmatpush.msra.mxu3 %v63_v2  ;;  %s593_s26 = sshll.u32 %s769_s25, 4  ;;  %s594_s26 = int_to_ptr.vmem [resolvable:$true] %s593_s26 }
  0x12   :  { %265 = vmatpush.msra.mxu2 %v62_v3  ;;  %154 = vmatpush.msra.mxu0 %v61_v5 }
  0x13   :  { %212 = vmatpush.msra.mxu1 %v61_v5  ;;  %155 = vmatmul.f32.vlgmr.msra.gmra.mxu0 %v758_v6 }
  0x14   :  { %266 = vmatpush.msra.mxu2 %v61_v5  ;;  %319 = vmatpush.msra.mxu3 %v62_v3 }
  0x15   :  { %371 = vmatpush.msrb.mxu0 %v64_v1  ;;  %425 = vmatpush.msrb.mxu1 %v64_v1 }
  0x16   :  { %479 = vmatpush.msrb.mxu2 %v64_v1  ;;  %320 = vmatpush.msra.mxu3 %v61_v5 }
  0x17   :  { %372 = vmatpush.msrb.mxu0 %v63_v2  ;;  %426 = vmatpush.msrb.mxu1 %v63_v2 }
  0x18   :  { %480 = vmatpush.msrb.mxu2 %v63_v2  ;;  %533 = vmatpush.msrb.mxu3 %v64_v1 }
  0x19   :  { %373 = vmatpush.msrb.mxu0 %v62_v3  ;;  %427 = vmatpush.msrb.mxu1 %v62_v3 }
  0x1a   :  { %481 = vmatpush.msrb.mxu2 %v62_v3  ;;  %534 = vmatpush.msrb.mxu3 %v63_v2 }
  0x1b   :  { %374 = vmatpush.msrb.mxu0 %v61_v5  ;;  %428 = vmatpush.msrb.mxu1 %v61_v5 }
  0x1c   :  { %482 = vmatpush.msrb.mxu2 %v61_v5  ;;  %535 = vmatpush.msrb.mxu3 %v62_v3 }
  0x1d   :  { %631 = vset.pattern.permute.xlu2 %v761_v27  ;;  %632 = vset.pattern.permute.xlu1 %v762_v45 }
  0x1e   :  { %536 = vmatpush.msrb.mxu3 %v61_v5  ;;  %633 = vset.pattern.permute.xlu0 %v763_v63 }
  0x7f   :  { %v89_v8 = vpop.permute.xlu0 %88 }
  0x80   :  { %v91_v9 = vmul.f32 %v827_v7, %v89_v8 }
  0x82   :  { %v92_v11 = vadd.f32 %v833_v10, %v91_v9 }
  0x90   :  { %v156_v12 = vpop.f32.mrf.mxu0 }
  0x91   :  { %v159_v13 = vadd.f32 %v156_v12, %v92_v11 }
  0x93   :  { %643 = vtanh.f32 %v159_v13 }
  0x99   :  { %v644_v16 = vpop.eup %643 }
  0x9a   :  { %v161_v17 = vmul.f32 %v644_v16, %v839_v14 }
  0x9c   :  { %v162_v18 = vadd.f32 %v844_v15, %v161_v17 }
  0x9e   :  { %165 = vrot.lane.b32.xlu0 %v162_v18, %s759_s3  ;;  %v163_v21 = vmul.f32 0.0, %v162_v18 }
 0x110   :  { %v166_v19 = vpop.permute.xlu0 %165 }
 0x111   :  { %v168_v20 = vmul.f32 %v166_v19, %v162_v18 }
 0x113   :  { %170 = vrot.lane.b32.xlu1 %v168_v20, %s760_s22 }
 0x185   :  { %v171_v22 = vpop.permute.xlu1 %170 }
 0x186   :  { %v173_v23 = vadd.f32 %v171_v22, %v163_v21  ;;  %v764_v22 = vmov 4  }
 0x188   :  { %645 = vtanh.f32 %v173_v23 }
 0x18e   :  { %v646_v24 = vpop.eup %645 }
 0x18f   :  { %176 = vrot.lane.b32.xlu1 %v646_v24, %s759_s3 }
 0x201   :  { %v177_v25 = vpop.permute.xlu1 %176 }
 0x202   :  { %v851_v26 = vmul.f32 %v177_v25, %v162_v18 }
 0x204   :  { %193 = vrot.lane.b32.xlu2 %v851_v26, %s760_s22 }
 0x20c   :  { %94 = vperm.xlu2 %631, %v824_v4  }
 0x25e   :  { %v194_v28 = vpop.permute.xlu2 %193 }
 0x25f   :  { %606 = vmatmul.msk.f32.vlgmr.msra.gmra.mxu1 %vm135_vm0, %v194_v28 }
 0x266   :  { %v95_v29 = vpop.permute.xlu2 %94 }
 0x267   :  { %v97_v30 = vmul.f32 %v827_v7, %v95_v29 }
 0x269   :  { %v98_v31 = vadd.f32 %v833_v10, %v97_v30 }
 0x2dc   :  { %v214_v32 = vpop.f32.mrf.mxu1 }
 0x2dd   :  { %v217_v33 = vadd.f32 %v214_v32, %v98_v31 }
 0x2df   :  { %647 = vtanh.f32 %v217_v33 }
 0x2e5   :  { %v648_v34 = vpop.eup %647 }
 0x2e6   :  { %v219_v35 = vmul.f32 %v648_v34, %v839_v14 }
 0x2e8   :  { %v220_v36 = vadd.f32 %v844_v15, %v219_v35 }
 0x2ea   :  { %223 = vrot.lane.b32.xlu0 %v220_v36, %s759_s3  ;;  %v221_v39 = vmul.f32 %v220_v36, %v173_v23 }
 0x35c   :  { %v224_v37 = vpop.permute.xlu0 %223 }
 0x35d   :  { %v226_v38 = vmul.f32 %v224_v37, %v220_v36 }
 0x35f   :  { %228 = vrot.lane.b32.xlu1 %v226_v38, %s760_s22 }
 0x367   :  { %100 = vperm.xlu1 %632, %v824_v4  }
 0x3d1   :  { %v229_v40 = vpop.permute.xlu1 %228 }
 0x3d2   :  { %v231_v41 = vadd.f32 %v229_v40, %v221_v39 }
 0x3d4   :  { %649 = vtanh.f32 %v231_v41 }
 0x3d9   :  { %v101_v47 = vpop.permute.xlu1 %100 }
 0x3da   :  { %v650_v42 = vpop.eup %649  ;;  %v103_v48 = vmul.f32 %v827_v7, %v101_v47 }
 0x3db   :  { %234 = vrot.lane.b32.xlu2 %v650_v42, %s759_s3 }
 0x3dc   :  { %v104_v49 = vadd.f32 %v833_v10, %v103_v48 }
 0x435   :  { %v235_v43 = vpop.permute.xlu2 %234 }
 0x436   :  { %v864_v44 = vmul.f32 %v235_v43, %v220_v36 }
 0x438   :  { %247 = vrot.lane.b32.xlu0 %v864_v44, %s760_s22 }
 0x4aa   :  { %v248_v46 = vpop.permute.xlu0 %247 }
 0x4ab   :  { %607 = vmatmul.msk.f32.vlgmr.msra.gmra.mxu2 %vm135_vm0, %v248_v46 }
 0x52e   :  { %v268_v50 = vpop.f32.mrf.mxu2 }
 0x52f   :  { %v271_v51 = vadd.f32 %v268_v50, %v104_v49 }
 0x531   :  { %651 = vtanh.f32 %v271_v51 }
 0x537   :  { %v652_v52 = vpop.eup %651 }
 0x538   :  { %v273_v53 = vmul.f32 %v652_v52, %v839_v14 }
 0x53a   :  { %v274_v54 = vadd.f32 %v844_v15, %v273_v53 }
 0x53c   :  { %277 = vrot.lane.b32.xlu2 %v274_v54, %s759_s3  ;;  %v275_v57 = vmul.f32 %v274_v54, %v231_v41  ;;  %v765_v41 = vmov 5  }
 0x596   :  { %v278_v55 = vpop.permute.xlu2 %277 }
 0x597   :  { %v280_v56 = vmul.f32 %v278_v55, %v274_v54 }
 0x599   :  { %282 = vrot.lane.b32.xlu0 %v280_v56, %s760_s22 }
 0x5a1   :  { %106 = vperm.xlu0 %633, %v824_v4  }
 0x5a9   :  { %634 = vset.pattern.permute.xlu0 %v764_v22 }
 0x5aa   :  { %112 = vperm.xlu0 %634, %v824_v4  }
 0x5b2   :  { %635 = vset.pattern.permute.xlu0 %v765_v41 }
 0x5b3   :  { %118 = vperm.xlu0 %635, %v824_v4  }
 0x60b   :  { %v283_v58 = vpop.permute.xlu0 %282 }
 0x60c   :  { %v285_v59 = vadd.f32 %v283_v58, %v275_v57 }
 0x60e   :  { %653 = vtanh.f32 %v285_v59 }
 0x613   :  { %v107_v1 = vpop.permute.xlu0 %106 }
 0x614   :  { %v654_v60 = vpop.eup %653  ;;  %v109_v2 = vmul.f32 %v827_v7, %v107_v1 }
 0x615   :  { %288 = vrot.lane.b32.xlu1 %v654_v60, %s759_s3  ;;  %v766_v60 = vmov 6  }
 0x616   :  { %v110_v3 = vadd.f32 %v833_v10, %v109_v2  ;;  %636 = vset.pattern.permute.xlu0 %v766_v60 }
 0x617   :  { %124 = vperm.xlu0 %636, %v824_v4  }
 0x61c   :  { %v113_v24 = vpop.permute.xlu0 %112 }
 0x61d   :  { %v115_v25 = vmul.f32 %v827_v7, %v113_v24 }
 0x61f   :  { %v116_v27 = vadd.f32 %v833_v10, %v115_v25 }
 0x625   :  { %v119_v43 = vpop.permute.xlu0 %118 }
 0x626   :  { %v121_v45 = vmul.f32 %v827_v7, %v119_v43 }
 0x628   :  { %v122_v46 = vadd.f32 %v833_v10, %v121_v45 }
 0x687   :  { %v289_v61 = vpop.permute.xlu1 %288 }
 0x688   :  { %v877_v62 = vmul.f32 %v289_v61, %v274_v54 }
 0x689   :  { %v125_v63 = vpop.permute.xlu0 %124 }
 0x68a   :  { %301 = vrot.lane.b32.xlu2 %v877_v62, %s760_s22 }
 0x6e4   :  { %v302_v0 = vpop.permute.xlu2 %301 }
 0x6e5   :  { %608 = vmatmul.msk.f32.vlgmr.msra.gmra.mxu3 %vm135_vm0, %v302_v0  ;;  %v127_v0 = vmul.f32 %v827_v7, %v125_v63 }
 0x6e7   :  { %v128_v1 = vadd.f32 %v833_v10, %v127_v0 }
 0x768   :  { %v322_v5 = vpop.f32.mrf.mxu3 }
 0x769   :  { %v325_v6 = vadd.f32 %v322_v5, %v110_v3 }
 0x76b   :  { %655 = vtanh.f32 %v325_v6 }
 0x771   :  { %v656_v8 = vpop.eup %655 }
 0x772   :  { %v327_v9 = vmul.f32 %v656_v8, %v839_v14 }
 0x774   :  { %v328_v11 = vadd.f32 %v844_v15, %v327_v9 }
 0x776   :  { %331 = vrot.lane.b32.xlu1 %v328_v11, %s759_s3  ;;  %v329_v16 = vmul.f32 %v328_v11, %v285_v59 }
 0x7e8   :  { %v332_v12 = vpop.permute.xlu1 %331 }
 0x7e9   :  { %v334_v13 = vmul.f32 %v332_v12, %v328_v11 }
 0x7eb   :  { %336 = vrot.lane.b32.xlu2 %v334_v13, %s760_s22 }
 0x845   :  { %v337_v17 = vpop.permute.xlu2 %336 }
 0x846   :  { %v339_v18 = vadd.f32 %v337_v17, %v329_v16 }
 0x848   :  { %657 = vtanh.f32 %v339_v18 }
 0x84e   :  { %v658_v19 = vpop.eup %657 }
 0x84f   :  { %342 = vrot.lane.b32.xlu1 %v658_v19, %s759_s3 }
 0x8c1   :  { %v343_v20 = vpop.permute.xlu1 %342 }
 0x8c2   :  { %v890_v21 = vmul.f32 %v343_v20, %v328_v11  ;;  %v767_v20 = vmov 7  }
 0x8c3   :  { %637 = vset.pattern.permute.xlu0 %v767_v20 }
 0x8c4   :  { %355 = vrot.lane.b32.xlu2 %v890_v21, %s760_s22  ;;  %130 = vperm.xlu0 %637, %v824_v4   ;;  %v642_v4 = vld [vmem:[%s976_s6] ss:$0 sm:$0xff] }
 0x91e   :  { %v356_v23 = vpop.permute.xlu2 %355 }
 0x91f   :  { %609 = vmatmul.msk.f32.vlgmr.msrb.gmra.mxu0 %vm135_vm0, %v356_v23 }
 0x936   :  { %v131_v23 = vpop.permute.xlu0 %130 }
 0x937   :  { %v133_v24 = vmul.f32 %v827_v7, %v131_v23 }
 0x939   :  { %v134_v25 = vadd.f32 %v833_v10, %v133_v24 }
 0x99c   :  { %v376_v28 = vpop.f32.mrf.mxu0 }
 0x99d   :  { %v379_v29 = vadd.f32 %v376_v28, %v116_v27 }
 0x99f   :  { %659 = vtanh.f32 %v379_v29 }
 0x9a5   :  { %v660_v30 = vpop.eup %659 }
 0x9a6   :  { %v381_v31 = vmul.f32 %v660_v30, %v839_v14 }
 0x9a8   :  { %v382_v32 = vadd.f32 %v844_v15, %v381_v31 }
 0x9aa   :  { %385 = vrot.lane.b32.xlu1 %v382_v32, %s759_s3  ;;  %v383_v35 = vmul.f32 %v382_v32, %v339_v18 }
 0xa1c   :  { %v386_v33 = vpop.permute.xlu1 %385 }
 0xa1d   :  { %v388_v34 = vmul.f32 %v386_v33, %v382_v32 }
 0xa1f   :  { %390 = vrot.lane.b32.xlu2 %v388_v34, %s760_s22 }
 0xa79   :  { %v391_v36 = vpop.permute.xlu2 %390 }
 0xa7a   :  { %v393_v37 = vadd.f32 %v391_v36, %v383_v35 }
 0xa7c   :  { %661 = vtanh.f32 %v393_v37 }
 0xa82   :  { %v662_v38 = vpop.eup %661 }
 0xa83   :  { %396 = vrot.lane.b32.xlu1 %v662_v38, %s759_s3 }
 0xaf5   :  { %v397_v39 = vpop.permute.xlu1 %396 }
 0xaf6   :  { %v903_v40 = vmul.f32 %v397_v39, %v382_v32 }
 0xaf8   :  { %409 = vrot.lane.b32.xlu2 %v903_v40, %s760_s22 }
 0xb52   :  { %v410_v42 = vpop.permute.xlu2 %409 }
 0xb53   :  { %610 = vmatmul.msk.f32.vlgmr.msrb.gmra.mxu1 %vm135_vm0, %v410_v42 }
 0xbd0   :  { %v430_v47 = vpop.f32.mrf.mxu1 }
 0xbd1   :  { %v433_v48 = vadd.f32 %v430_v47, %v122_v46 }
 0xbd3   :  { %663 = vtanh.f32 %v433_v48 }
 0xbd9   :  { %v664_v49 = vpop.eup %663 }
 0xbda   :  { %v435_v50 = vmul.f32 %v664_v49, %v839_v14 }
 0xbdc   :  { %v436_v51 = vadd.f32 %v844_v15, %v435_v50 }
 0xbde   :  { %439 = vrot.lane.b32.xlu1 %v436_v51, %s759_s3  ;;  %v437_v54 = vmul.f32 %v436_v51, %v393_v37 }
 0xc50   :  { %v440_v52 = vpop.permute.xlu1 %439 }
 0xc51   :  { %v442_v53 = vmul.f32 %v440_v52, %v436_v51 }
 0xc53   :  { %444 = vrot.lane.b32.xlu2 %v442_v53, %s760_s22 }
 0xcad   :  { %v445_v55 = vpop.permute.xlu2 %444 }
 0xcae   :  { %v447_v56 = vadd.f32 %v445_v55, %v437_v54 }
 0xcb0   :  { %665 = vtanh.f32 %v447_v56 }
 0xcb6   :  { %v666_v57 = vpop.eup %665 }
 0xcb7   :  { %450 = vrot.lane.b32.xlu1 %v666_v57, %s759_s3 }
 0xd29   :  { %v451_v58 = vpop.permute.xlu1 %450 }
 0xd2a   :  { %v916_v59 = vmul.f32 %v451_v58, %v436_v51 }
 0xd2c   :  { %463 = vrot.lane.b32.xlu2 %v916_v59, %s760_s22 }
 0xd86   :  { %v464_v61 = vpop.permute.xlu2 %463 }
 0xd87   :  { %611 = vmatmul.msk.f32.vlgmr.msrb.gmra.mxu2 %vm135_vm0, %v464_v61 }
 0xe0a   :  { %v484_v2 = vpop.f32.mrf.mxu2 }
 0xe0b   :  { %v487_v3 = vadd.f32 %v484_v2, %v128_v1 }
 0xe0d   :  { %667 = vtanh.f32 %v487_v3 }
 0xe13   :  { %v668_v5 = vpop.eup %667 }
 0xe14   :  { %v489_v6 = vmul.f32 %v668_v5, %v839_v14 }
 0xe16   :  { %v490_v8 = vadd.f32 %v844_v15, %v489_v6 }
 0xe18   :  { %493 = vrot.lane.b32.xlu1 %v490_v8, %s759_s3  ;;  %v491_v12 = vmul.f32 %v490_v8, %v447_v56 }
 0xe8a   :  { %v494_v9 = vpop.permute.xlu1 %493 }
 0xe8b   :  { %v496_v11 = vmul.f32 %v494_v9, %v490_v8  ;;  %v584_v9 = vstv %s977_s7 }
 0xe8d   :  { %498 = vrot.lane.b32.xlu2 %v496_v11, %s760_s22 }
 0xee7   :  { %v499_v13 = vpop.permute.xlu2 %498 }
 0xee8   :  { %v501_v16 = vadd.f32 %v499_v13, %v491_v12 }
 0xeea   :  { %669 = vtanh.f32 %v501_v16 }
 0xef0   :  { %v670_v17 = vpop.eup %669 }
 0xef1   :  { %504 = vrot.lane.b32.xlu1 %v670_v17, %s759_s3 }
 0xf63   :  { %v505_v18 = vpop.permute.xlu1 %504 }
 0xf64   :  { %v507_v19 = vmul.f32 %v505_v18, %v490_v8 }
 0xf66   :  { %517 = vrot.lane.b32.xlu2 %v507_v19, %s760_s22 }
 0xfc0   :  { %v518_v22 = vpop.permute.xlu2 %517 }
 0xfc1   :  { %612 = vmatmul.msk.f32.vlgmr.msrb.gmra.mxu3 %vm135_vm0, %v518_v22 }
0x1044   :  { %v538_v27 = vpop.f32.mrf.mxu3 }
0x1045   :  { %v541_v28 = vadd.f32 %v538_v27, %v134_v25 }
0x1047   :  { %671 = vtanh.f32 %v541_v28 }
0x104d   :  { %v672_v29 = vpop.eup %671 }
0x104e   :  { %v543_v30 = vmul.f32 %v672_v29, %v839_v14 }
0x1050   :  { %v544_v31 = vadd.f32 %v844_v15, %v543_v30 }
0x1052   :  { %547 = vrot.lane.b32.xlu1 %v544_v31, %s759_s3  ;;  %v545_v15 = vmul.f32 %v544_v31, %v501_v16 }
0x105a   :  { %180 = vrot.lane.b32.xlu1 %v642_v4, %s768_s23 }
0x10c4   :  { %v548_v32 = vpop.permute.xlu1 %547 }
0x10c5   :  { %v550_v7 = vmul.f32 %v548_v32, %v544_v31 }
0x10c7   :  { %552 = vrot.lane.b32.xlu2 %v550_v7, %s760_s22 }
0x10cc   :  { %v181_v10 = vpop.permute.xlu1 %180 }
0x10cd   :  { %v183_v33 = vmul.f32 %v181_v10, %v851_v26  ;;  %v238_v34 = vmul.f32 %v864_v44, %v181_v10  ;;  %v292_v14 = vmul.f32 %v877_v62, %v181_v10  ;;  %v346_v42 = vmul.f32 %v890_v21, %v181_v10 }
0x10ce   :  { %v454_v43 = vmul.f32 %v916_v59, %v181_v10  ;;  %v508_v45 = vmul.f32 %v507_v19, %v181_v10  ;;  %v400_v53 = vmul.f32 %v903_v40, %v181_v10 }
0x10cf   :  { %185 = vrot.lane.b32.xlu2 %v183_v33, %s760_s22  ;;  %240 = vrot.lane.b32.xlu1 %v238_v34, %s760_s22 }
0x10d7   :  { %294 = vrot.lane.b32.xlu1 %v292_v14, %s760_s22 }
0x1121   :  { %v553_v35 = vpop.permute.xlu2 %552 }
0x1122   :  { %v555_v36 = vadd.f32 %v553_v35, %v545_v15 }
0x1124   :  { %673 = vtanh.f32 %v555_v36 }
0x1129   :  { %v186_v37 = vpop.permute.xlu2 %185 }
0x112a   :  { %v674_v38 = vpop.eup %673  ;;  %v189_v39 = vsel %vm188_vm1, %v186_v37, 0.0 }
0x112b   :  { %190 = vadd.xlane.f32.xlu0 %v189_v39  ;;  %558 = vrot.lane.b32.xlu1 %v674_v38, %s759_s3 }
0x1141   :  { %v241_v26 = vpop.permute.xlu1 %240 }
0x1142   :  { %v243_v44 = vsel %vm188_vm1, %v241_v26, 0.0 }
0x1143   :  { %244 = vadd.xlane.f32.xlu2 %v243_v44 }
0x1149   :  { %v295_v41 = vpop.permute.xlu1 %294 }
0x114a   :  { %v297_v62 = vsel %vm188_vm1, %v295_v41, 0.0 }
0x1155   :  { %298 = vadd.xlane.f32.xlu1 %v297_v62 }
0x115b   :  { %348 = vrot.lane.b32.xlu2 %v346_v42, %s760_s22 }
0x1163   :  { %456 = vrot.lane.b32.xlu2 %v454_v43, %s760_s22 }
0x116e   :  { %510 = vrot.lane.b32.xlu1 %v508_v45, %s760_s22 }
0x119d   :  { %v559_v49 = vpop.permute.xlu1 %558 }
0x119e   :  { %v191_v50 = vpop.xlane.xlu0 %190  ;;  %v561_v54 = vmul.f32 %v559_v49, %v544_v31 }
0x11a0   :  { %v562_v55 = vmul.f32 %v561_v54, %v181_v10 }
0x11b6   :  { %v245_v46 = vpop.xlane.xlu2 %244 }
0x11b7   :  { %v571_v51 = vsel %vm570_vm2, %v191_v50, %v245_v46 }
0x11be   :  { %v349_v47 = vpop.permute.xlu2 %348 }
0x11bf   :  { %v351_v48 = vsel %vm188_vm1, %v349_v47, 0.0 }
0x11c0   :  { %352 = vadd.xlane.f32.xlu0 %v351_v48 }
0x11c6   :  { %v457_v58 = vpop.permute.xlu2 %456 }
0x11c7   :  { %v459_v59 = vsel %vm188_vm1, %v457_v58, 0.0 }
0x11c8   :  { %v299_v21 = vpop.xlane.xlu1 %298 }
0x11c9   :  { %v573_v52 = vsel %vm572_vm3, %v571_v51, %v299_v21 }
0x11d4   :  { %402 = vrot.lane.b32.xlu0 %v400_v53, %s760_s22 }
0x11dc   :  { %564 = vrot.lane.b32.xlu0 %v562_v55, %s760_s22 }
0x11e0   :  { %v511_v56 = vpop.permute.xlu1 %510 }
0x11e1   :  { %v513_v57 = vsel %vm188_vm1, %v511_v56, 0.0 }
0x11e2   :  { %514 = vadd.xlane.f32.xlu1 %v513_v57 }
0x1206   :  { %460 = vadd.xlane.f32.xlu0 %v459_v59 }
0x1233   :  { %v353_v60 = vpop.xlane.xlu0 %352 }
0x1234   :  { %v575_v61 = vsel %vm574_vm4, %v573_v52, %v353_v60 }
0x1246   :  { %v403_v63 = vpop.permute.xlu0 %402 }
0x1247   :  { %v405_v40 = vsel %vm188_vm1, %v403_v63, 0.0 }
0x1248   :  { %406 = vadd.xlane.f32.xlu2 %v405_v40 }
0x124e   :  { %v565_v0 = vpop.permute.xlu0 %564 }
0x124f   :  { %v567_v1 = vsel %vm188_vm1, %v565_v0, 0.0 }
0x1250   :  { %568 = vadd.xlane.f32.xlu2 %v567_v1 }
0x1255   :  { %v515_v8 = vpop.xlane.xlu1 %514 }
0x1279   :  { %v461_v5 = vpop.xlane.xlu0 %460 }
0x12bb   :  { %v407_v2 = vpop.xlane.xlu2 %406 }
0x12bc   :  { %v577_v3 = vsel %vm576_vm5, %v575_v61, %v407_v2 }
0x12bd   :  { %v579_v6 = vsel %vm578_vm6, %v577_v3, %v461_v5 }
0x12be   :  { %v581_v12 = vsel %vm580_vm7, %v579_v6, %v515_v8 }
0x12c3   :  { %v569_v11 = vpop.xlane.xlu2 %568 }
0x12c4   :  { %v583_v13 = vsel %vm582_vm8, %v581_v12, %v569_v11 }
0x12c5   :  { %v585_v16 = vadd.f32 %v584_v9, %v583_v13 }
0x12c7   :  { %587 = vst.msk [vmem:[#allocation8] sm:$0x3] %vm586_vm9, %v585_v16 }
0x12c8   :  { %598 = dma.vmem_to_hbm [thread:$0]  %s594_s26, 32, %s596_s29, [#allocation5]  }
0x12c9   :  { %751 = dma.done.wait [#allocation5], 32  }
0x12ca   :  { %752 = vsyncadd [#allocation5], 4294967264 }
0x12cb   :  { %603 = vsyncpa [#allocation4], 1 }
0x12cc   :  { %604 = vsyncpa [#allocation7], 1 }
0x12cd   :  { %605 = vsyncpa [#allocation5], 1 }

</bundles_post_ra>
